<compile_context>
chip_gen: v5e
topology: v5e:2x2
jax: 0.10.0
libtpu: 0.0.40
codegen_flags: <defaults>
</compile_context>

<pallas_src>
import jax
import jax.numpy as jnp
from jax import lax
from jax.experimental import pallas as pl
from jax.experimental.pallas import tpu as pltpu


def _embed_kernel(x_ref, w_ref, b_ref, o_ref):
    """One (b_blk, i) grid step: out[b, i-tile] = x[b]^T(over seq) @ W + bias.

    x_ref: (Bb, S, tm)  -- natural (batch, seq, variate) layout block
    w_ref: (S, D)       -- full weight, VMEM-resident (constant index_map)
    b_ref: (1, D)       -- full bias, VMEM-resident
    o_ref: (Bb, tm, D)
    """
    bb = x_ref.shape[0]
    bias = b_ref[...].astype(jnp.float32)  # (1, D)
    # Static (unrolled) loop over the small batch block; each iteration is one
    # 2-D transposed-LHS MXU matmul contracting the seq axis (no explicit transpose).
    for bi in range(bb):
        out = lax.dot_general(
            x_ref[bi],            # (S, tm)
            w_ref[...],           # (S, D)
            dimension_numbers=(((0,), (0,)), ((), ())),
            preferred_element_type=jnp.float32,
        )                         # -> (tm, D)
        o_ref[bi] = (out + bias).astype(o_ref.dtype)


def _largest_divisor_leq(n, cap):
    for d in range(min(n, cap), 0, -1):
        if n % d == 0:
            return d
    return 1


@jax.jit
def data_embedding_inverted(x, w, bias, x_mark=None):
    """Pallas equivalent of DataEmbedding_inverted.forward (eval mode).

    Args:
      x:      (B, seq_len, N_variates)
      w:      (seq_len, d_model)   -- value_embedding weight, already transposed
                                      from PyTorch's (d_model, seq_len) layout.
      bias:   (d_model,)
      x_mark: optional (B, seq_len, N_marks)

    Returns:
      (B, N_variates [+ N_marks], d_model)
    """
    if x_mark is not None:
        # Concat on the variate axis in the NATURAL layout; commutes with the
        # row-wise Linear, so this matches cat([x.T, x_mark.T], dim=1) exactly.
        x = jnp.concatenate([x, x_mark], axis=-1)

    B, S, NV = x.shape
    Sw, D = w.shape
    assert Sw == S, f"weight seq dim {Sw} != input seq dim {S}"

    # Variate-axis tiling: typical inverted-embedding NV is tiny (7..300), so the
    # full extent is the common case.  Only very large NV gets padded + tiled.
    TM_CAP = 512
    if NV <= TM_CAP:
        tm = NV
        NVp = NV
    else:
        tm = 256  # multiple of both 8 and 128 -> always a legal block dim
        NVp = -(-NV // tm) * tm
        if NVp != NV:
            x = jnp.pad(x, ((0, 0), (0, 0), (0, NVp - NV)))

    # Block a few batches per grid step to amortize per-step overhead.
    Bb = _largest_divisor_leq(B, 8)
    grid = (B // Bb, NVp // tm)

    itemsize = jnp.dtype(x.dtype).itemsize
    # Double-buffered estimate: W + bias + x block + out block.
    est_vmem = 2 * (
        S * D * jnp.dtype(w.dtype).itemsize
        + D * jnp.dtype(bias.dtype).itemsize
        + Bb * S * tm * itemsize
        + Bb * tm * D * itemsize
    )
    cp_kwargs = dict(dimension_semantics=("parallel", "parallel"))
    if est_vmem > (32 << 20):
        # Raise the scoped VMEM limit (cap at 64 MiB so this remains legal on v7x).
        cp_kwargs["vmem_limit_bytes"] = min(int(est_vmem) + (4 << 20), 64 << 20)
    compiler_params = pltpu.CompilerParams(**cp_kwargs)

    out = pl.pallas_call(
        _embed_kernel,
        out_shape=jax.ShapeDtypeStruct((B, NVp, D), x.dtype),
        grid_spec=pltpu.PrefetchScalarGridSpec(
            num_scalar_prefetch=0,
            grid=grid,
            in_specs=[
                # x in natural (B, seq, variate) layout: contiguous slab per batch block.
                pl.BlockSpec((Bb, S, tm), lambda b, i: (b, 0, i)),
                # Full weight, constant index -> fetched once, VMEM-resident thereafter.
                pl.BlockSpec((S, D), lambda b, i: (0, 0)),
                # Full bias, constant index.
                pl.BlockSpec((1, D), lambda b, i: (0, 0)),
            ],
            out_specs=pl.BlockSpec((Bb, tm, D), lambda b, i: (b, i, 0)),
        ),
        compiler_params=compiler_params,
    )(x, w, bias.reshape(1, D))

    if NVp != NV:
        out = out[:, :NV, :]
    return out


def _reference(x, x_mark, w, bias):
    """Pure-JAX reference matching the PyTorch module (eval mode)."""
    xp = jnp.swapaxes(x, 1, 2)  # (B, N, S)
    if x_mark is not None:
        xp = jnp.concatenate([xp, jnp.swapaxes(x_mark, 1, 2)], axis=1)
    return xp @ w + bias


if __name__ == "__main__":
    key = jax.random.PRNGKey(0)
    k_x, k_m, k_w, k_b = jax.random.split(key, 4)

    # Small demo shapes (d_model = 128 keeps the output lane-dense).
    batch, seq_len, n_variates, n_marks, d_model = 2, 16, 6, 4, 128

    x = jax.random.normal(k_x, (batch, seq_len, n_variates), dtype=jnp.float32)
    x_mark = jax.random.normal(k_m, (batch, seq_len, n_marks), dtype=jnp.float32)

    # Linear(seq_len, d_model) parameters; weight stored as (seq_len, d_model).
    bound = 1.0 / (seq_len ** 0.5)
    w = jax.random.uniform(
        k_w, (seq_len, d_model), dtype=jnp.float32, minval=-bound, maxval=bound
    )
    bias = jax.random.uniform(
        k_b, (d_model,), dtype=jnp.float32, minval=-bound, maxval=bound
    )

    # With x_mark.
    out = data_embedding_inverted(x, w, bias, x_mark)
    out = jax.block_until_ready(out)
    ref = _reference(x, x_mark, w, bias)
    assert out.shape == (batch, n_variates + n_marks, d_model)
    assert jnp.allclose(out, ref, atol=1e-5, rtol=1e-5), float(
        jnp.max(jnp.abs(out - ref))
    )

    # Without x_mark (the x_mark is None branch).
    out2 = data_embedding_inverted(x, w, bias, None)
    out2 = jax.block_until_ready(out2)
    ref2 = _reference(x, None, w, bias)
    assert out2.shape == (batch, n_variates, d_model)
    assert jnp.allclose(out2, ref2, atol=1e-5, rtol=1e-5)

    print("KERNEL_OK")
</pallas_src>

<mosaic_0001>
module attributes {stable_mosaic.version = 11 : i64} {
  func.func @_embed_kernel(%arg0: i32, %arg1: i32, %arg2: memref<2x16x10xf32, #tpu.memory_space<vmem>>, %arg3: memref<16x128xf32, #tpu.memory_space<vmem>>, %arg4: memref<1x128xf32, #tpu.memory_space<vmem>>, %arg5: memref<2x10x128xf32, #tpu.memory_space<vmem>>) attributes {dimension_semantics = [#tpu.dimension_semantics<parallel>, #tpu.dimension_semantics<parallel>], iteration_bounds = array<i64: 1, 1>, scalar_prefetch = 0 : i64, scratch_operands = 0 : i64, tpu.core_type = #tpu.core_type<tc>, window_params = [{transform_indices = @transform_0, window_bounds = array<i64: 2, 16, 10>}, {pipeline_mode = #tpu.pipeline_mode<synchronous>, transform_indices = @transform_1, window_bounds = array<i64: 16, 128>}, {pipeline_mode = #tpu.pipeline_mode<synchronous>, transform_indices = @transform_2, window_bounds = array<i64: 1, 128>}, {transform_indices = @transform_3, window_bounds = array<i64: 2, 10, 128>}]} {
    %c0 = arith.constant 0 : index
    %c0_0 = arith.constant 0 : index
    %0 = vector.load %arg4[%c0, %c0_0] : memref<1x128xf32, #tpu.memory_space<vmem>>, vector<1x128xf32>
    %c0_1 = arith.constant 0 : index
    %c0_2 = arith.constant 0 : index
    %c0_3 = arith.constant 0 : index
    %1 = vector.load %arg2[%c0_1, %c0_2, %c0_3] : memref<2x16x10xf32, #tpu.memory_space<vmem>>, vector<1x16x10xf32>
    %2 = vector.shape_cast %1 : vector<1x16x10xf32> to vector<16x10xf32>
    %c0_4 = arith.constant 0 : index
    %c0_5 = arith.constant 0 : index
    %3 = vector.load %arg3[%c0_4, %c0_5] : memref<16x128xf32, #tpu.memory_space<vmem>>, vector<16x128xf32>
    %cst = arith.constant dense<0.000000e+00> : vector<10x128xf32>
    %4 = tpu.matmul %2, %3, %cst {dimension_numbers = #tpu.dot_dimension_numbers<[0], [0], [1], [1], [0, 1, 1, 1], [], []>} : vector<16x10xf32>, vector<16x128xf32>, vector<10x128xf32> -> vector<10x128xf32>
    %5 = vector.broadcast %0 : vector<1x128xf32> to vector<10x128xf32>
    %6 = arith.addf %4, %5 : vector<10x128xf32>
    %c0_6 = arith.constant 0 : index
    %c0_7 = arith.constant 0 : index
    %c0_8 = arith.constant 0 : index
    %7 = vector.load %arg5[%c0_6, %c0_7, %c0_8] : memref<2x10x128xf32, #tpu.memory_space<vmem>>, vector<1x10x128xf32>
    %8 = vector.shape_cast %7 : vector<1x10x128xf32> to vector<10x128xf32>
    %9 = vector.shape_cast %6 : vector<10x128xf32> to vector<1x10x128xf32>
    tpu.vector_store %arg5[%c0_6, %c0_7, %c0_8], %9 {strides = array<i32>} : memref<2x10x128xf32, #tpu.memory_space<vmem>>, vector<1x10x128xf32>,
    %c1 = arith.constant 1 : index
    %c0_9 = arith.constant 0 : index
    %c0_10 = arith.constant 0 : index
    %10 = vector.load %arg2[%c1, %c0_9, %c0_10] : memref<2x16x10xf32, #tpu.memory_space<vmem>>, vector<1x16x10xf32>
    %11 = vector.shape_cast %10 : vector<1x16x10xf32> to vector<16x10xf32>
    %c0_11 = arith.constant 0 : index
    %c0_12 = arith.constant 0 : index
    %12 = vector.load %arg3[%c0_11, %c0_12] : memref<16x128xf32, #tpu.memory_space<vmem>>, vector<16x128xf32>
    %cst_13 = arith.constant dense<0.000000e+00> : vector<10x128xf32>
    %13 = tpu.matmul %11, %12, %cst_13 {dimension_numbers = #tpu.dot_dimension_numbers<[0], [0], [1], [1], [0, 1, 1, 1], [], []>} : vector<16x10xf32>, vector<16x128xf32>, vector<10x128xf32> -> vector<10x128xf32>
    %14 = vector.broadcast %0 : vector<1x128xf32> to vector<10x128xf32>
    %15 = arith.addf %13, %14 : vector<10x128xf32>
    %c1_14 = arith.constant 1 : index
    %c0_15 = arith.constant 0 : index
    %c0_16 = arith.constant 0 : index
    %16 = vector.load %arg5[%c1_14, %c0_15, %c0_16] : memref<2x10x128xf32, #tpu.memory_space<vmem>>, vector<1x10x128xf32>
    %17 = vector.shape_cast %16 : vector<1x10x128xf32> to vector<10x128xf32>
    %18 = vector.shape_cast %15 : vector<10x128xf32> to vector<1x10x128xf32>
    tpu.vector_store %arg5[%c1_14, %c0_15, %c0_16], %18 {strides = array<i32>} : memref<2x10x128xf32, #tpu.memory_space<vmem>>, vector<1x10x128xf32>,
    return
  }
  func.func @transform_0(%arg0: i32, %arg1: i32) -> (i32, i32, i32) {
    %c0_i32 = arith.constant 0 : i32
    %c0_i32_0 = arith.constant 0 : i32
    return %arg0, %c0_i32, %arg1 : i32, i32, i32
  }
  func.func @transform_1(%arg0: i32, %arg1: i32) -> (i32, i32) {
    %c0_i32 = arith.constant 0 : i32
    %c0_i32_0 = arith.constant 0 : i32
    %c0_i32_1 = arith.constant 0 : i32
    return %c0_i32, %c0_i32_0 : i32, i32
  }
  func.func @transform_2(%arg0: i32, %arg1: i32) -> (i32, i32) {
    %c0_i32 = arith.constant 0 : i32
    %c0_i32_0 = arith.constant 0 : i32
    %c0_i32_1 = arith.constant 0 : i32
    return %c0_i32, %c0_i32_0 : i32, i32
  }
  func.func @transform_3(%arg0: i32, %arg1: i32) -> (i32, i32, i32) {
    %c0_i32 = arith.constant 0 : i32
    %c0_i32_0 = arith.constant 0 : i32
    return %arg0, %arg1, %c0_i32 : i32, i32, i32
  }
}

</mosaic_0001>

<bundles_post_ra>
// kernel: data_embedding_inverted.1
= control target key start
LH: loop header
LB: loop body
LE: loop exit
PB: predicated region body
PF: predicated region fallthrough
CT: control target
= control target key end

     0   :  { %vm54_vm0 = vcmask 130048   ;;  %s226_s0 = inlined_call_operand.vmem [shape: f32[2,16,10], index: 0, kind: input, shape index: {}]   ;;  %s227_s1 = inlined_call_operand.vmem [shape: f32[16,128], index: 1, kind: input, shape index: {}]   ;;  %s228_s2 = inlined_call_operand.vmem [shape: f32[1,128], index: 2, kind: input, shape index: {}]   ;;  %s229_s3 = inlined_call_operand.vmem [shape: f32[2,10,128], index: 3, kind: output, shape index: {}]  }
   0x1   :  { %v161_v0 = vld [vmem:[%s226_s0 + $0x10] sm:$0xff]  ;;  %v15_v1 = vld [vmem:[%s226_s0] sm:$0xff]  ;;  %v18_v2 = vld [vmem:[%s227_s1 + $0x8] sm:$0xff] }
   0x2   :  { %91 = vxpose.xlu1.b32.start [1/2] (short) (narrow) %v161_v0, 16  ;;  %22 = vxpose.xlu0.b32.start [1/2] (short) (narrow) %v15_v1, 16  ;;  %v17_v3 = vld [vmem:[%s227_s1] sm:$0xff]  ;;  %v162_v4 = vld [vmem:[%s226_s0 + $0x18] sm:$0xff]  ;;  %v16_v5 = vld [vmem:[%s226_s0 + $0x8] sm:$0xff] }
   0x3   :  { %75 = vmatpush.msra.mxu0 %v18_v2  ;;  %143 = vmatpush.msra.mxu1 %v18_v2  ;;  %v172_v10 = vld [vmem:[%s228_s2] ss:$0 sm:$0xff] }
   0x4   :  { %167 = vmatpush.msra.mxu2 %v18_v2  ;;  %169 = vmatpush.msra.mxu3 %v18_v2 }
   0x5   :  { %76 = vmatpush.msra.mxu0 %v17_v3  ;;  %144 = vmatpush.msra.mxu1 %v17_v3 }
   0x6   :  { %168 = vmatpush.msra.mxu2 %v17_v3  ;;  %170 = vmatpush.msra.mxu3 %v17_v3 }
   0xa   :  { %92 = vxpose.xlu1.b32.end [2/2] (short) (narrow) %v162_v4, 16  ;;  %23 = vxpose.xlu0.b32.end [2/2] (short) (narrow) %v16_v5, 16 }
  0xa6   :  { %v107_v6 = vpop.trf.xlu1  ;;  %v38_v7 = vpop.trf.xlu0 }
  0xa7   :  { %159 = vmatmul.msk.f32.vlgmr.msra.gmra.mxu0 %vm54_vm0, %v38_v7  ;;  %163 = vmatmul.msk.f32.vlgmr.msra.gmra.mxu1 %vm54_vm0, %v107_v6 }
  0xae   :  { %v108_v8 = vpop.trf.xlu1  ;;  %v39_v9 = vpop.trf.xlu0 }
  0xaf   :  { %160 = vmatmul.msk.f32.vlgmr.msra.gmra.mxu2 %vm54_vm0, %v39_v9  ;;  %164 = vmatmul.msk.f32.vlgmr.msra.gmra.mxu3 %vm54_vm0, %v108_v8 }
 0x124   :  { %v78_v11 = vpop.f32.mrf.mxu0  ;;  %v146_v12 = vpop.f32.mrf.mxu1 }
 0x125   :  { %v79_v13 = vadd.f32 %v172_v10, %v78_v11  ;;  %v147_v14 = vadd.f32 %v172_v10, %v146_v12 }
 0x127   :  { %84 = vst [vmem:[%s229_s3] sm:$0xff] %v79_v13 }
 0x128   :  { %165 = vst [vmem:[%s229_s3 + $0x10] sm:$0xff] %v147_v14 }
 0x132   :  { %v81_v15 = vpop.f32.mrf.mxu2  ;;  %v149_v16 = vpop.f32.mrf.mxu3 }
 0x133   :  { %v82_v17 = vadd.f32 %v172_v10, %v81_v15  ;;  %v150_v18 = vadd.f32 %v172_v10, %v149_v16 }
 0x135   :  { %85 = vst [vmem:[%s229_s3 + $0x8] sm:$0x3] %v82_v17 }
 0x136   :  { %166 = vst [vmem:[%s229_s3 + $0x18] sm:$0x3] %v150_v18 }

</bundles_post_ra>
